<compile_context>
chip_gen: v7x
topology: tpu7x:2x2x1
jax: 0.10.0
libtpu: 0.0.40
codegen_flags: <defaults>
</compile_context>

<pallas_src>
import functools
import math

import jax
import jax.numpy as jnp
from jax.experimental import pallas as pl
from jax.experimental.pallas import tpu as pltpu


# --------------------------------------------------------------------------- helpers

def _pick_tile(dim, cap, mult):
    """Largest tile <= cap that divides `dim` and is a multiple of `mult`.
    Falls back to the full dim (block dim == array dim is always legal)."""
    if dim <= cap:
        return dim
    for t in range(cap, 0, -1):
        if dim % t == 0 and t % mult == 0:
            return t
    return dim


def _pick_head_group(num_heads, q_tile, kv_tile, score_budget_bytes=2 * 1024 * 1024):
    """Heads batched per attention grid step, budgeted by the f32 score footprint
    (hg * tq * tk * 4 bytes) so s/p stay small even on v7x's 64 MiB VMEM."""
    per_head = q_tile * kv_tile * 4
    max_hg = max(1, score_budget_bytes // per_head)
    best = 1
    for hg in range(1, num_heads + 1):
        if num_heads % hg == 0 and hg <= max_hg:
            best = hg
    return best


# --------------------------------------------------------------------------- kernels

def matmul_kernel(x_ref, w_ref, o_ref, acc_ref, *, compute_dtype):
    """K-tiled matmul: per-tile cast to bf16 operands, f32 accumulation in VMEM."""
    @pl.when(pl.program_id(2) == 0)
    def _init():
        acc_ref[...] = jnp.zeros_like(acc_ref)

    acc_ref[...] += jnp.dot(x_ref[...].astype(compute_dtype),
                            w_ref[...].astype(compute_dtype),
                            preferred_element_type=jnp.float32)

    @pl.when(pl.program_id(2) == pl.num_programs(2) - 1)
    def _store():
        o_ref[...] = acc_ref[...].astype(o_ref.dtype)


def flash_attn_kernel(q_ref, k_ref, v_ref, o_ref, m_sc, l_sc, acc_sc,
                      *, scale, q_tile, kv_tile):
    """Causal flash attention for one (batch, head-group, q-tile) over KV tiles.

    Blocks are (1, Hg, tile, Dh); scores/softmax/accumulation stay in float32,
    matmul operands are the (bf16) input dtype. The causal mask is only applied
    on tiles straddling the diagonal, as a 2D head-invariant comparison."""
    qi = pl.program_id(2)
    ki = pl.program_id(3)
    q_start = qi * q_tile
    kv_start = ki * kv_tile

    @pl.when(ki == 0)
    def _init():
        m_sc[...] = jnp.full_like(m_sc, -jnp.inf)
        l_sc[...] = jnp.zeros_like(l_sc)
        acc_sc[...] = jnp.zeros_like(acc_sc)

    def _scores():
        # fold the softmax scale into the small (Hg, tq, Dh) q tile, not the scores
        q = q_ref[0] * scale                   # (Hg, q_tile, Dh), stays bf16
        return jnp.einsum("hqd,hkd->hqk", q, k_ref[0],
                          preferred_element_type=jnp.float32)

    def _update(s):
        m_prev = m_sc[...]
        m_new = jnp.maximum(m_prev, jnp.max(s, axis=-1, keepdims=True))
        alpha = jnp.exp(m_prev - m_new)
        p = jnp.exp(s - m_new)
        l_sc[...] = alpha * l_sc[...] + jnp.sum(p, axis=-1, keepdims=True)
        acc_sc[...] = alpha * acc_sc[...] + jnp.einsum(
            "hqk,hkd->hqd", p.astype(v_ref.dtype), v_ref[0],
            preferred_element_type=jnp.float32)
        m_sc[...] = m_new

    # Tile entirely at-or-below the causal diagonal: no mask needed at all.
    fully_visible = kv_start + (kv_tile - 1) <= q_start
    # Tile straddling the diagonal: needs the 2D mask.
    straddles = jnp.logical_and(kv_start <= q_start + (q_tile - 1),
                                kv_start + (kv_tile - 1) > q_start)
    # Fully-masked tiles fall into neither branch: the clamped index_map keeps the
    # previously-resident KV block (no DMA) and no compute runs.

    @pl.when(fully_visible)
    def _no_mask():
        _update(_scores())

    @pl.when(straddles)
    def _masked():
        s = _scores()
        row = jax.lax.broadcasted_iota(jnp.int32, (q_tile, kv_tile), 0)
        col = jax.lax.broadcasted_iota(jnp.int32, (q_tile, kv_tile), 1)
        mask = (row - col) >= (kv_start - q_start)          # 2D, head-invariant
        s = jnp.where(mask[None, :, :], s, -1e30)
        _update(s)

    @pl.when(ki == pl.num_programs(3) - 1)
    def _finalize():
        inv_l = pl.reciprocal(l_sc[...], approx=True)   # EUP reciprocal (free slot)
        o_ref[0] = (acc_sc[...] * inv_l).astype(o_ref.dtype)


# --------------------------------------------------------------------------- wrappers

def pallas_linear(x, w, out_dtype=None, compute_dtype=jnp.bfloat16,
                  tm_cap=512, tn_cap=512, tk_cap=512):
    """x: (M, K) @ w: (K, N) -> (M, N). bf16 MXU matmul (x cast per-tile in-kernel),
    f32 accumulation, no bias."""
    M, K = x.shape
    Kw, N = w.shape
    assert K == Kw
    if out_dtype is None:
        out_dtype = x.dtype

    tm = _pick_tile(M, tm_cap, 8)
    tn = _pick_tile(N, tn_cap, 128)
    tk = _pick_tile(K, tk_cap, 128)
    grid = (M // tm, N // tn, K // tk)

    kernel = functools.partial(matmul_kernel, compute_dtype=compute_dtype)
    return pl.pallas_call(
        kernel,
        out_shape=jax.ShapeDtypeStruct((M, N), out_dtype),
        grid_spec=pltpu.PrefetchScalarGridSpec(
            num_scalar_prefetch=0,
            grid=grid,
            in_specs=[
                pl.BlockSpec((tm, tk), lambda i, j, k: (i, k)),
                pl.BlockSpec((tk, tn), lambda i, j, k: (k, j)),
            ],
            out_specs=pl.BlockSpec((tm, tn), lambda i, j, k: (i, j)),
            scratch_shapes=[pltpu.VMEM((tm, tn), jnp.float32)]),
        compiler_params=pltpu.CompilerParams(
            dimension_semantics=("parallel", "parallel", "arbitrary"),
            # NOTE: on v5e/v6e (128 MiB VMEM) this and the tile caps can be raised
            # (e.g. tn=1024, 64-96 MiB) for better roofline; kept safe for v7x.
            vmem_limit_bytes=32 * 1024 * 1024),
    )(x, w)


def pallas_flash_attention(q, k, v, scale):
    """q, k, v: (B, H, S, Dh), same dtype (bf16 expected). Returns (B, H, S, Dh)."""
    B, H, S, Dh = q.shape
    out_dtype = q.dtype

    tq = _pick_tile(S, 256, 16)    # bf16 sublane-aligned q tile
    tk = _pick_tile(S, 256, 128)   # lane-dense KV tile (N dim of QK^T / scores)
    hg = _pick_head_group(H, tq, tk)
    grid = (B, H // hg, S // tq, S // tk)  # KV (reduction) axis last, "arbitrary"

    def q_map(b, h, qi, ki):
        return (b, h, qi, 0)

    def kv_map(b, h, qi, ki):
        # Clamp to the last KV tile this q block can see: fully-masked iterations
        # revisit the already-resident block, so Pallas issues no new DMA.
        last_needed = (qi * tq + (tq - 1)) // tk
        return (b, h, jnp.minimum(ki, last_needed), 0)

    kernel = functools.partial(flash_attn_kernel, scale=scale,
                               q_tile=tq, kv_tile=tk)

    return pl.pallas_call(
        kernel,
        out_shape=jax.ShapeDtypeStruct((B, H, S, Dh), out_dtype),
        grid_spec=pltpu.PrefetchScalarGridSpec(
            num_scalar_prefetch=0,
            grid=grid,
            in_specs=[
                pl.BlockSpec((1, hg, tq, Dh), q_map),
                pl.BlockSpec((1, hg, tk, Dh), kv_map),
                pl.BlockSpec((1, hg, tk, Dh), kv_map),
            ],
            out_specs=pl.BlockSpec((1, hg, tq, Dh), q_map),
            scratch_shapes=[
                # TODO(synk): (hg, tq, 1) stats pad to 128 lanes in VMEM; with the
                # score-budgeted hg this is <~2 MiB total, kept 3D for robust
                # lane-broadcast lowering against the (hg, tq, tk) scores.
                pltpu.VMEM((hg, tq, 1), jnp.float32),    # running max
                pltpu.VMEM((hg, tq, 1), jnp.float32),    # running denominator
                pltpu.VMEM((hg, tq, Dh), jnp.float32),   # output accumulator
            ]),
        compiler_params=pltpu.CompilerParams(
            dimension_semantics=("parallel", "parallel", "parallel", "arbitrary"),
            # NOTE: v5e/v6e can raise tq to 512 and this limit to 64-96 MiB to halve
            # KV re-streaming; kept at 32 MiB so it also fits v7x's 64 MiB VMEM.
            vmem_limit_bytes=32 * 1024 * 1024),
    )(q, k, v)


# --------------------------------------------------------------------------- rotary glue

def fixed_pos_embedding(dim, seq_len):
    inv_freq = 1.0 / (10000.0 ** (jnp.arange(0, dim, 2, dtype=jnp.float32) / dim))
    sinusoid = jnp.arange(seq_len, dtype=jnp.float32)[:, None] * inv_freq[None, :]
    return jnp.sin(sinusoid), jnp.cos(sinusoid)


def rotate_every_two(x):
    x1 = x[..., ::2]
    x2 = x[..., 1::2]
    y = jnp.stack((-x2, x1), axis=-1)
    return y.reshape(y.shape[:-2] + (-1,))


def apply_rotary_pos_emb(x, sincos, offset=0):
    # x: (B, S, H, rot_dim); math in f32, result cast back to x.dtype (bf16)
    sin, cos = sincos
    S = x.shape[1]
    sin = jnp.repeat(sin[offset:S + offset], 2, axis=-1)[None, :, None, :]
    cos = jnp.repeat(cos[offset:S + offset], 2, axis=-1)[None, :, None, :]
    return (x * cos + rotate_every_two(x) * sin).astype(x.dtype)


# --------------------------------------------------------------------------- module

class ProGenAttentionPallas:
    def __init__(self, hidden_size, num_attention_heads, rotary_dim, key):
        self.embed_dim = hidden_size
        self.num_attention_heads = num_attention_heads
        self.head_dim = hidden_size // num_attention_heads
        assert self.head_dim * num_attention_heads == hidden_size
        self.rotary_dim = rotary_dim
        self.scale_attn = math.sqrt(self.head_dim)

        k1, k2 = jax.random.split(key)
        scale = 1.0 / math.sqrt(hidden_size)
        # stored as (in, out) so the kernel computes x @ w; kept in bf16 (MXU dtype),
        # matmul accumulation stays in f32 inside the kernel.
        self.w_qkv = (jax.random.normal(k1, (hidden_size, 3 * hidden_size),
                                        jnp.float32) * scale).astype(jnp.bfloat16)
        self.w_out = (jax.random.normal(k2, (hidden_size, hidden_size),
                                        jnp.float32) * scale).astype(jnp.bfloat16)

    def _split_heads(self, x, mp_num):
        # x: (B, S, mp_num, local_dim) -> (B, S, H, head_dim), same mapping as PyTorch
        r = x.reshape(x.shape[:-1] + (self.num_attention_heads // mp_num, self.head_dim))
        return r.reshape(x.shape[:-2] + (-1, self.head_dim))

    def forward(self, hidden_states):
        B, S, E = hidden_states.shape
        H, Dh = self.num_attention_heads, self.head_dim
        mp_num = 8
        final_dtype = hidden_states.dtype

        # qkv projection (Pallas tiled bf16 matmul, f32 accumulation, bf16 output
        # so all inter-kernel intermediates stay bf16)
        qkv = pallas_linear(hidden_states.reshape(B * S, E), self.w_qkv,
                            out_dtype=jnp.bfloat16)
        qkv = qkv.reshape(B, S, 3 * E)

        # GPT-J style mp_num split: order is (query, value, key)
        qkv_split = qkv.reshape(B, S, mp_num, -1)
        local_dim = Dh * H // mp_num
        query = qkv_split[..., :local_dim]
        value = qkv_split[..., local_dim:2 * local_dim]
        key = qkv_split[..., 2 * local_dim:]

        query = self._split_heads(query, mp_num)    # (B, S, H, Dh) bf16
        key = self._split_heads(key, mp_num)        # (B, S, H, Dh) bf16
        value = self._split_heads(value, mp_num)    # (B, S, H, Dh) bf16
        value = jnp.transpose(value, (0, 2, 1, 3))  # (B, H, S, Dh)

        # rotary position embedding (offset=0, no layer_past); cheap VPU work in XLA.
        if self.rotary_dim is not None:
            k_rot, k_pass = key[..., :self.rotary_dim], key[..., self.rotary_dim:]
            q_rot, q_pass = query[..., :self.rotary_dim], query[..., self.rotary_dim:]
            sincos = fixed_pos_embedding(self.rotary_dim, S)
            k_rot = apply_rotary_pos_emb(k_rot, sincos)
            q_rot = apply_rotary_pos_emb(q_rot, sincos)
            key = jnp.concatenate([k_rot, k_pass], axis=-1)
            query = jnp.concatenate([q_rot, q_pass], axis=-1)
        else:
            sincos = fixed_pos_embedding(Dh, S)
            key = apply_rotary_pos_emb(key, sincos)
            query = apply_rotary_pos_emb(query, sincos)

        # TODO(synk): fuse rotary + the (B,S,H,Dh)->(B,H,S,Dh) relayout into the
        # attention kernel (or read (B,S,H,Dh) blocks directly) to remove these
        # bf16 XLA transposes; kept as XLA ops for Mosaic-lowering robustness.
        key = jnp.transpose(key, (0, 2, 1, 3))      # (B, H, S, Dh)
        query = jnp.transpose(query, (0, 2, 1, 3))  # (B, H, S, Dh)

        # flash-style causal attention over head groups (Pallas), scale = 1/sqrt(Dh);
        # q/k/v already bf16, no wrapper casts.
        attn = pallas_flash_attention(query, key, value, 1.0 / self.scale_attn)
        # TODO(synk): writing the output directly in (B, S, E) from the kernel needs
        # an in-kernel (Hg,tq,Dh)->(tq,Hg*Dh) relayout; kept as a bf16 XLA transpose.
        attn = attn.transpose(0, 2, 1, 3).reshape(B, S, E)

        # output projection (Pallas tiled bf16 matmul), final output in input dtype
        out = pallas_linear(attn.reshape(B * S, E), self.w_out,
                            out_dtype=final_dtype).reshape(B, S, E)
        # TODO(synk): attn_dropout / resid_dropout are identity in eval mode, omitted.
        return out


# --------------------------------------------------------------------------- main

if __name__ == "__main__":
    # small config consistent with the module: hidden=128, heads=8 (divisible by
    # mp_num=8), head_dim=16, rotary_dim=8, batch=2, seq=8
    B, S, E, H, ROT = 2, 8, 128, 8, 8

    key = jax.random.PRNGKey(0)
    k_params, k_input = jax.random.split(key)

    module = ProGenAttentionPallas(hidden_size=E, num_attention_heads=H,
                                   rotary_dim=ROT, key=k_params)
    hidden_states = jax.random.normal(k_input, (B, S, E), jnp.float32)

    out = module.forward(hidden_states)
    jax.block_until_ready(out)
    assert out.shape == (B, S, E)
    assert bool(jnp.all(jnp.isfinite(out)))
    print("KERNEL_OK")
</pallas_src>

<mosaic_0001>
module attributes {stable_mosaic.version = 11 : i64} {
  func.func @matmul_kernel(%arg0: i32, %arg1: i32, %arg2: i32, %arg3: memref<16x128xf32, #tpu.memory_space<vmem>>, %arg4: memref<128x384xbf16, #tpu.memory_space<vmem>>, %arg5: memref<16x384xbf16, #tpu.memory_space<vmem>>, %arg6: memref<16x384xf32, #tpu.memory_space<vmem>>) attributes {dimension_semantics = [#tpu.dimension_semantics<parallel>, #tpu.dimension_semantics<parallel>, #tpu.dimension_semantics<arbitrary>], iteration_bounds = array<i64: 1, 1, 1>, scalar_prefetch = 0 : i64, scratch_operands = 1 : i64, tpu.core_type = #tpu.core_type<tc>, window_params = [{transform_indices = @transform_0, window_bounds = array<i64: 16, 128>}, {transform_indices = @transform_1, window_bounds = array<i64: 128, 384>}, {transform_indices = @transform_2, window_bounds = array<i64: 16, 384>}]} {
    %c0_i32 = arith.constant 0 : i32
    %0 = arith.cmpi eq, %arg2, %c0_i32 : i32
    %1 = arith.extui %0 : i1 to i32
    %c0_i32_0 = arith.constant 0 : i32
    %2 = arith.cmpi ne, %1, %c0_i32_0 : i32
    scf.if %2 {
      %cst_10 = arith.constant 0.000000e+00 : f32
      %13 = vector.broadcast %cst_10 : f32 to vector<16x384xf32>
      %c0_11 = arith.constant 0 : index
      %c0_12 = arith.constant 0 : index
      %14 = vector.load %arg6[%c0_11, %c0_12] : memref<16x384xf32, #tpu.memory_space<vmem>>, vector<16x384xf32>
      tpu.vector_store %arg6[%c0_11, %c0_12], %13 {strides = array<i32>} : memref<16x384xf32, #tpu.memory_space<vmem>>, vector<16x384xf32>,
    } else {
    }
    %c0 = arith.constant 0 : index
    %c0_1 = arith.constant 0 : index
    %3 = vector.load %arg6[%c0, %c0_1] : memref<16x384xf32, #tpu.memory_space<vmem>>, vector<16x384xf32>
    %c0_2 = arith.constant 0 : index
    %c0_3 = arith.constant 0 : index
    %4 = vector.load %arg3[%c0_2, %c0_3] : memref<16x128xf32, #tpu.memory_space<vmem>>, vector<16x128xf32>
    %5 = arith.truncf %4 : vector<16x128xf32> to vector<16x128xbf16>
    %c0_4 = arith.constant 0 : index
    %c0_5 = arith.constant 0 : index
    %6 = vector.load %arg4[%c0_4, %c0_5] : memref<128x384xbf16, #tpu.memory_space<vmem>>, vector<128x384xbf16>
    %cst = arith.constant dense<0.000000e+00> : vector<16x384xf32>
    %7 = tpu.matmul %5, %6, %cst {dimension_numbers = #tpu.dot_dimension_numbers<[1], [0], [0], [1], [0, 0, 1, 1], [], []>} : vector<16x128xbf16>, vector<128x384xbf16>, vector<16x384xf32> -> vector<16x384xf32>
    %8 = arith.addf %3, %7 : vector<16x384xf32>
    %c0_6 = arith.constant 0 : index
    %c0_7 = arith.constant 0 : index
    %9 = vector.load %arg6[%c0_6, %c0_7] : memref<16x384xf32, #tpu.memory_space<vmem>>, vector<16x384xf32>
    tpu.vector_store %arg6[%c0_6, %c0_7], %8 {strides = array<i32>} : memref<16x384xf32, #tpu.memory_space<vmem>>, vector<16x384xf32>,
    %c0_i32_8 = arith.constant 0 : i32
    %10 = arith.cmpi eq, %arg2, %c0_i32_8 : i32
    %11 = arith.extui %10 : i1 to i32
    %c0_i32_9 = arith.constant 0 : i32
    %12 = arith.cmpi ne, %11, %c0_i32_9 : i32
    scf.if %12 {
      %c0_10 = arith.constant 0 : index
      %c0_11 = arith.constant 0 : index
      %13 = vector.load %arg6[%c0_10, %c0_11] : memref<16x384xf32, #tpu.memory_space<vmem>>, vector<16x384xf32>
      %14 = arith.truncf %13 : vector<16x384xf32> to vector<16x384xbf16>
      %c0_12 = arith.constant 0 : index
      %c0_13 = arith.constant 0 : index
      %15 = vector.load %arg5[%c0_12, %c0_13] : memref<16x384xbf16, #tpu.memory_space<vmem>>, vector<16x384xbf16>
      tpu.vector_store %arg5[%c0_12, %c0_13], %14 {strides = array<i32>} : memref<16x384xbf16, #tpu.memory_space<vmem>>, vector<16x384xbf16>,
    } else {
    }
    return
  }
  func.func @transform_0(%arg0: i32, %arg1: i32, %arg2: i32) -> (i32, i32) {
    %c0_i32 = arith.constant 0 : i32
    return %arg0, %arg2 : i32, i32
  }
  func.func @transform_1(%arg0: i32, %arg1: i32, %arg2: i32) -> (i32, i32) {
    %c0_i32 = arith.constant 0 : i32
    return %arg2, %arg1 : i32, i32
  }
  func.func @transform_2(%arg0: i32, %arg1: i32, %arg2: i32) -> (i32, i32) {
    %c0_i32 = arith.constant 0 : i32
    return %arg0, %arg1 : i32, i32
  }
}

</mosaic_0001>

<bundles_post_ra>
// kernel: tpu_custom_call.1
= control target key start
LH: loop header
LB: loop body
LE: loop exit
PB: predicated region body
PF: predicated region fallthrough
CT: control target
= control target key end

     0   :  { %7 = vsyncpa [#allocation4], 0  ;;  %s609_s0 = inlined_call_operand.hbm [shape: f32[16,128], index: 0, kind: input, shape index: {}]   ;;  %s610_s1 = inlined_call_operand.hbm [shape: bf16[128,384], index: 1, kind: input, shape index: {}]   ;;  %s611_s2 = inlined_call_operand.hbm [shape: bf16[16,384], index: 2, kind: output, shape index: {}]  }
   0x1   :  { %8 = vsyncpa [#allocation7], 0 }
   0x2   :  { %9 = vsyncpa [#allocation5], 0  ;;  %s542_s9 = smov [#allocation3]   ;;  %s470_s13 = scalar_lea.hbm %s609_s0, 256 }
   0x3   :  { %s15_s10 = sshll.u32 %s542_s9, 4  ;;  %p471_p0 = scmp.ne.s32.totalorder %s609_s0, %s470_s13  ;;  %s16_s10 = int_to_ptr.vmem [resolvable:$true] %s15_s10 }
   0x4   :  { %p474_p1 = scmp.lt.u32.totalorder %s470_s13, %s609_s0 }
   0x6   :  { %p476_p2 = pnand %p474_p1, %p471_p0 }
   0x8   :  { %479 = shalt.err (!%p476_p2)
}
   0x9   :  { %s480_s18 = scalar_lea.vmem %s16_s10, 256  ;;  %p485_p4 = scmp.lt.s32.totalorder %s16_s10, %s16_s10 }
   0xa   :  { %p481_p3 = scmp.ne.s32.totalorder %s16_s10, %s480_s18  ;;  %p486_p5 = scmp.lt.s32.totalorder %s480_s18, %s480_s18 }
   0xc   :  { %p487_p6 = por %p486_p5, %p485_p4 }
   0xe   :  { %p488_p7 = pnand %p487_p6, %p481_p3 }
  0x10   :  { %491 = shalt.err (!%p488_p7)
}
  0x11   :  { %s543_s19 = smov 128   ;;  %s544_s20 = smov 8  }
  0x12   :  { %21 = dma.hbm_to_vmem [thread:$0]  %s609_s0, 256, %s16_s10, [#allocation4], %s543_s19, %s543_s19, %s544_s20  }
  0x13   :  { %s545_s23 = smov [#allocation6]   ;;  %s492_s27 = scalar_lea.hbm %s610_s1, 3072 }
  0x14   :  { %s27_s24 = sshll.u32 %s545_s23, 4  ;;  %p493_p8 = scmp.ne.s32.totalorder %s610_s1, %s492_s27  ;;  %s28_s24 = int_to_ptr.vmem [resolvable:$true] %s27_s24 }
  0x15   :  { %p496_p9 = scmp.lt.u32.totalorder %s492_s27, %s610_s1 }
  0x17   :  { %p498_p10 = pnand %p496_p9, %p493_p8 }
  0x19   :  { %501 = shalt.err (!%p498_p10)
}
  0x1a   :  { %s502_s4 = scalar_lea.vmem %s28_s24, 3072  ;;  %p507_p12 = scmp.lt.s32.totalorder %s28_s24, %s28_s24 }
  0x1b   :  { %p503_p11 = scmp.ne.s32.totalorder %s28_s24, %s502_s4  ;;  %p508_p13 = scmp.lt.s32.totalorder %s502_s4, %s502_s4 }
  0x1d   :  { %p509_p0 = por %p508_p13, %p507_p12 }
  0x1f   :  { %p510_p1 = pnand %p509_p0, %p503_p11 }
  0x21   :  { %513 = shalt.err (!%p510_p1)
}
  0x22   :  { %s546_s0 = smov 192   ;;  %s547_s5 = smov 12  }
  0x23   :  { %33 = dma.hbm_to_vmem [thread:$0]  %s610_s1, 3072, %s28_s24, [#allocation7], %s546_s0, %s546_s0, %s547_s5  }
  0x24   :  { %536 = dma.done.wait [#allocation4], 256  }
  0x25   :  { %537 = vsyncadd [#allocation4], 4294967040 }
  0x26   :  { %538 = dma.done.wait [#allocation7], 3072  }
  0x27   :  { %539 = vsyncadd [#allocation7], 4294964224  ;;  %v548_v0 = vmov 0.0   ;;  %vm549_vm0 = vmmov 0   ;;  %v550_v1 = vmov 0   ;;  %v57_v25 = vld [vmem:[#allocation3] sm:$0xff] }
  0x28   :  { %408 = vmatprep.subr.bf16.mxu1 %v548_v0  ;;  %424 = vmatprep.mubr.msk.bf16.mxu1 %vm549_vm0, %v548_v0  ;;  %v438_v2 = vld [vmem:[#allocation6 + $0x4] ss:$12 sps:$4 sm:$0xff]   ;;  %v440_v3 = vld [vmem:[#allocation6 + $0x8] ss:$12 sps:$4 sm:$0xff]   ;;  %v441_v4 = vld [vmem:[#allocation6] ss:$12 sps:$4 sm:$0xff]  }
  0x29   :  { %252 = vmatprep.mubr.bf16.mxu0 %v550_v1  ;;  %220 = vmatprep.subr.bf16.mxu0 %v438_v2  ;;  %v442_v5 = vld [vmem:[#allocation6 + $0x1c] ss:$12 sps:$4 sm:$0xff]   ;;  %v444_v6 = vld [vmem:[#allocation6 + $0x20] ss:$12 sps:$4 sm:$0xff]   ;;  %v445_v7 = vld [vmem:[#allocation6 + $0x18] ss:$12 sps:$4 sm:$0xff]  }
  0x2a   :  { %409 = vmatpush3.bf16.msra.mxu1 %v440_v3  ;;  %221 = vmatpush1.bf16.msra.mxu0 %v441_v4  ;;  %v446_v8 = vld [vmem:[#allocation6 + $0x34] ss:$12 sps:$4 sm:$0xff]   ;;  %v448_v9 = vld [vmem:[#allocation6 + $0x38] ss:$12 sps:$4 sm:$0xff]   ;;  %v449_v10 = vld [vmem:[#allocation6 + $0x30] ss:$12 sps:$4 sm:$0xff]  }
  0x2b   :  { %410 = vmatprep.subr.bf16.mxu1 %v548_v0  ;;  %222 = vmatprep.subr.bf16.mxu0 %v442_v5  ;;  %v450_v11 = vld [vmem:[#allocation6 + $0x4c] ss:$12 sps:$4 sm:$0xff]   ;;  %v452_v12 = vld [vmem:[#allocation6 + $0x50] ss:$12 sps:$4 sm:$0xff]   ;;  %v453_v13 = vld [vmem:[#allocation6 + $0x48] ss:$12 sps:$4 sm:$0xff]  }
  0x2c   :  { %v454_v14 = vld [vmem:[#allocation6 + $0x64] ss:$12 sps:$4 sm:$0xff]   ;;  %v456_v15 = vld [vmem:[#allocation6 + $0x68] ss:$12 sps:$4 sm:$0xff]   ;;  %v457_v16 = vld [vmem:[#allocation6 + $0x60] ss:$12 sps:$4 sm:$0xff]  }
  0x2d   :  { %v458_v17 = vld [vmem:[#allocation6 + $0x7c] ss:$12 sps:$4 sm:$0xff]   ;;  %v460_v18 = vld [vmem:[#allocation6 + $0x80] ss:$12 sps:$4 sm:$0xff]   ;;  %v461_v19 = vld [vmem:[#allocation6 + $0x78] ss:$12 sps:$4 sm:$0xff]  }
  0x2e   :  { %411 = vmatpush3.bf16.msra.mxu1 %v444_v6  ;;  %223 = vmatpush1.bf16.msra.mxu0 %v445_v7  ;;  %v462_v20 = vld [vmem:[#allocation6 + $0x94] ss:$12 sps:$4 sm:$0xff]   ;;  %v464_v21 = vld [vmem:[#allocation6 + $0x98] ss:$12 sps:$4 sm:$0xff]   ;;  %v465_v22 = vld [vmem:[#allocation6 + $0x90] ss:$12 sps:$4 sm:$0xff]  }
  0x2f   :  { %412 = vmatprep.subr.bf16.mxu1 %v548_v0  ;;  %224 = vmatprep.subr.bf16.mxu0 %v446_v8  ;;  %v466_v23 = vld [vmem:[#allocation6 + $0xac] ss:$12 sps:$4 sm:$0xff]   ;;  %v468_v24 = vld [vmem:[#allocation6 + $0xb0] ss:$12 sps:$4 sm:$0xff]   ;;  %v469_v27 = vld [vmem:[#allocation6 + $0xa8] ss:$12 sps:$4 sm:$0xff]  }
  0x30   :  { %v58_v26 = vld [vmem:[#allocation3 + $0x8] sm:$0xff]  ;;  %s551_s1 = smov [#allocation8]  }
  0x31   :  { %v59_v28 = vpack.c.bf16 %v58_v26, %v57_v25  ;;  %s354_s8 = sshll.u32 %s551_s1, 4  ;;  %s355_s8 = int_to_ptr.vmem [resolvable:$true] %s354_s8 }
  0x32   :  { %413 = vmatpush3.bf16.msra.mxu1 %v448_v9  ;;  %225 = vmatpush1.bf16.msra.mxu0 %v449_v10  ;;  %s514_s9 = scalar_lea.vmem %s355_s8, 384  ;;  %p519_p3 = scmp.lt.s32.totalorder %s355_s8, %s355_s8 }
  0x33   :  { %414 = vmatprep.subr.bf16.mxu1 %v548_v0  ;;  %226 = vmatprep.subr.bf16.mxu0 %v450_v11  ;;  %p515_p2 = scmp.ne.s32.totalorder %s355_s8, %s514_s9  ;;  %p520_p4 = scmp.lt.s32.totalorder %s514_s9, %s514_s9 }
  0x35   :  { %p521_p5 = por %p520_p4, %p519_p3 }
  0x36   :  { %415 = vmatpush3.bf16.msra.mxu1 %v452_v12  ;;  %227 = vmatpush1.bf16.msra.mxu0 %v453_v13 }
  0x37   :  { %416 = vmatprep.subr.bf16.mxu1 %v548_v0  ;;  %228 = vmatprep.subr.bf16.mxu0 %v454_v14  ;;  %p522_p6 = pnand %p521_p5, %p515_p2 }
  0x3a   :  { %417 = vmatpush3.bf16.msra.mxu1 %v456_v15  ;;  %229 = vmatpush1.bf16.msra.mxu0 %v457_v16 }
  0x3b   :  { %418 = vmatprep.subr.bf16.mxu1 %v548_v0  ;;  %230 = vmatprep.subr.bf16.mxu0 %v458_v17 }
  0x3e   :  { %419 = vmatpush3.bf16.msra.mxu1 %v460_v18  ;;  %231 = vmatpush1.bf16.msra.mxu0 %v461_v19 }
  0x3f   :  { %420 = vmatprep.subr.bf16.mxu1 %v548_v0  ;;  %232 = vmatprep.subr.bf16.mxu0 %v462_v20 }
  0x42   :  { %421 = vmatpush3.bf16.msra.mxu1 %v464_v21  ;;  %233 = vmatpush1.bf16.msra.mxu0 %v465_v22 }
  0x43   :  { %422 = vmatprep.subr.bf16.mxu1 %v548_v0  ;;  %234 = vmatprep.subr.bf16.mxu0 %v466_v23 }
  0x46   :  { %423 = vmatpush3.bf16.msra.mxu1 %v468_v24  ;;  %235 = vmatpush1.bf16.msra.mxu0 %v469_v27 }
  0x49   :  { %425 = vmatmul.mubr.bf16.vlgmr.msra.gmra.mrb[0].mxu1 %v59_v28  ;;  %253 = vmatmul.mubr.bf16.vlgmr.msra.gmra.mrb[0].mxu0 %v59_v28 }
 0x11c   :  { %v297_v29 = vpop.f32.mrb[0].mxu1  ;;  %v254_v31 = vpop.f32.mrb[0].mxu0 }
 0x11d   :  { %v396_v30 = vpack.c.bf16 %v297_v29, %v297_v29  ;;  %v426_v32 = vpop.f32.mrb[1].mxu1  ;;  %v256_v33 = vpop.f32.mrb[1].mxu0 }
 0x11e   :  { %v300_v34 = vpop.f32.mrb[2].mxu1  ;;  %v395_v35 = vpack.c.bf16 %v256_v33, %v254_v31  ;;  %v258_v37 = vpop.f32.mrb[2].mxu0 }
 0x11f   :  { %346 = vst [vmem:[#allocation8 + $0x8] sm:$0xf] %v396_v30  ;;  %v398_v36 = vpack.c.bf16 %v300_v34, %v300_v34  ;;  %v427_v38 = vpop.f32.mrb[3].mxu1  ;;  %v260_v39 = vpop.f32.mrb[3].mxu0 }
 0x120   :  { %345 = vst [vmem:[#allocation8] sm:$0xff] %v395_v35  ;;  %v397_v40 = vpack.c.bf16 %v260_v39, %v258_v37 }
 0x121   :  { %348 = vst [vmem:[#allocation8 + $0x14] sm:$0xf] %v398_v36 }
 0x122   :  { %347 = vst [vmem:[#allocation8 + $0xc] sm:$0xff] %v397_v40 }
 0x123   :  { %525 = shalt.err (!%p522_p6)
}
 0x124   :  { %s526_s12 = scalar_lea.hbm %s611_s2, 384 }
 0x125   :  { %p527_p7 = scmp.ne.s32.totalorder %s611_s2, %s526_s12  ;;  %p530_p8 = scmp.lt.u32.totalorder %s526_s12, %s611_s2 }
 0x127   :  { %p532_p9 = pnand %p530_p8, %p527_p7 }
 0x129   :  { %535 = shalt.err (!%p532_p9)
}
 0x12a   :  { %360 = dma.vmem_to_hbm [thread:$0]  %s355_s8, 384, %s611_s2, [#allocation5], %s546_s0, %s546_s0, %s547_s5  }
 0x12b   :  { %540 = dma.done.wait [#allocation5], 384  }
 0x12c   :  { %541 = vsyncadd [#allocation5], 4294966912 }
 0x12d   :  { %364 = vsyncpa [#allocation4], 1 }
 0x12e   :  { %365 = vsyncpa [#allocation7], 1 }
 0x12f   :  { %366 = vsyncpa [#allocation5], 1 }

</bundles_post_ra>
